<compile_context>
chip_gen: v6e
topology: v6e:2x2x1
jax: 0.10.0
libtpu: 0.0.40
codegen_flags: <defaults>
</compile_context>

<pallas_src>
import jax
import jax.numpy as jnp
from jax.experimental import pallas as pl
from jax.experimental.pallas import tpu as pltpu

N_DENSE = 13           # dense feature count
N_SPARSE = 26          # sparse feature count
EMB_DIM = 4            # embedding dim per sparse feature
VOCAB = 100            # vocabulary size per sparse feature
UNITS = N_DENSE + N_SPARSE * EMB_DIM   # = 117, matches Linear(117, ...)
UNITS_PAD = 128        # lane-aligned feature width used inside the kernel
HIDDEN = 256           # ResidualBlock hidden width
N_BLOCKS = 3


def _round_up(x, m):
    return (x + m - 1) // m * m


def deepcrossing_kernel(x_ref, w1_ref, b1_ref, w2_ref, b2_ref,
                        wo_ref, bo_ref, out_ref):
    """Per-batch-tile body.

    x_ref:  [TB, 128]       bf16 (feature-padded activations, streamed)
    w1_ref: [3, 128, 256]   bf16    b1_ref: [3, 1, 256] f32
    w2_ref: [3, 256, 128]   bf16    b2_ref: [3, 1, 128] f32
    wo_ref: [1, 128]        f32     bo_ref: [1, 1]      f32
    out_ref:[TB, 1]         f32
    """
    x_bf16 = x_ref[...]                    # bf16 tile, fed straight to block 0's MXU
    x = x_bf16.astype(jnp.float32)         # f32 residual path
    # Three residual blocks (statically unrolled). bf16 MXU operands, f32 acc.
    for i in range(N_BLOCKS):
        lhs = x_bf16 if i == 0 else x.astype(jnp.bfloat16)
        h = jnp.dot(lhs, w1_ref[i],
                    preferred_element_type=jnp.float32) + b1_ref[i]
        h = jnp.maximum(h, 0.0)                          # relu(dnn1(x))
        y = jnp.dot(h.astype(jnp.bfloat16), w2_ref[i],
                    preferred_element_type=jnp.float32) + b2_ref[i]
        x = jnp.maximum(x + y, 0.0)                      # relu(residual + dnn2)
    # Final 1-wide projection on VPU/XLU (avoid an N=1 MXU matmul).
    logits = jnp.sum(x * wo_ref[...], axis=-1, keepdims=True) + bo_ref[...]
    out_ref[...] = jax.nn.sigmoid(logits).astype(out_ref.dtype)


def deepcrossing_forward(dense_inputs, sparse_inputs, params, *, max_tile=2048):
    """dense_inputs: [B, 13] f32; sparse_inputs: [B, 26] int32."""
    B = dense_inputs.shape[0]

    # --- glue (fused under jit): single flat embedding gather + concat ---
    flat_emb = params["emb"].reshape(N_SPARSE * VOCAB, EMB_DIM)
    offsets = (jnp.arange(N_SPARSE, dtype=jnp.int32) * VOCAB)[None, :]
    idx = sparse_inputs.astype(jnp.int32) + offsets            # [B, 26]
    sparse_out = flat_emb[idx].reshape(B, N_SPARSE * EMB_DIM)  # [B, 104]
    x = jnp.concatenate([dense_inputs.astype(jnp.float32), sparse_out], axis=1)

    # --- pad feature axis 117 -> 128 with zeros (exact, see header) and
    #     stream the activation tile as bf16 (halves recurring HBM read) ---
    x = jnp.pad(x, ((0, 0), (0, UNITS_PAD - UNITS))).astype(jnp.bfloat16)

    # --- batch tiling ---
    # TB is a multiple of 8; guarantee >= 2 grid steps whenever B > 8 so the
    # "parallel" batch axis shards across both TensorCores on v7x.
    b8 = _round_up(B, 8)
    if b8 <= 8:
        TB = 8
    else:
        TB = min(max_tile, _round_up((b8 + 1) // 2, 8))
    B_pad = _round_up(b8, TB)
    if B_pad != B:
        x = jnp.pad(x, ((0, B_pad - B), (0, 0)))
    grid = (B_pad // TB,)

    # --- pack / pad / cast weights once (resident across all grid steps) ---
    pad_f = UNITS_PAD - UNITS
    w1 = jnp.pad(params["w1"], ((0, 0), (0, pad_f), (0, 0))).astype(jnp.bfloat16)
    b1 = params["b1"].astype(jnp.float32)
    w2 = jnp.pad(params["w2"], ((0, 0), (0, 0), (0, pad_f))).astype(jnp.bfloat16)
    b2 = jnp.pad(params["b2"], ((0, 0), (0, 0), (0, pad_f))).astype(jnp.float32)
    wo = jnp.pad(params["wo"].T, ((0, 0), (0, pad_f))).astype(jnp.float32)  # [1,128]
    bo = params["bo"].astype(jnp.float32)                                   # [1,1]

    out = pl.pallas_call(
        deepcrossing_kernel,
        out_shape=jax.ShapeDtypeStruct((B_pad, 1), jnp.float32),
        grid=grid,
        in_specs=[
            pl.BlockSpec((TB, UNITS_PAD), lambda i: (i, 0)),                   # x tile
            pl.BlockSpec((N_BLOCKS, UNITS_PAD, HIDDEN), lambda i: (0, 0, 0)),  # w1
            pl.BlockSpec((N_BLOCKS, 1, HIDDEN), lambda i: (0, 0, 0)),          # b1
            pl.BlockSpec((N_BLOCKS, HIDDEN, UNITS_PAD), lambda i: (0, 0, 0)),  # w2
            pl.BlockSpec((N_BLOCKS, 1, UNITS_PAD), lambda i: (0, 0, 0)),       # b2
            pl.BlockSpec((1, UNITS_PAD), lambda i: (0, 0)),                    # wo
            pl.BlockSpec((1, 1), lambda i: (0, 0)),                            # bo
        ],
        out_specs=pl.BlockSpec((TB, 1), lambda i: (i, 0)),
        compiler_params=pltpu.CompilerParams(
            dimension_semantics=("parallel",)),
    )(x, w1, b1, w2, b2, wo, bo)
    return out[:B]


# Jitted entry point: fuses the gather/concat/pad/bf16-cast glue with the
# pallas_call launch (no extra full-activation HBM round trips).
deepcrossing_forward_jit = jax.jit(deepcrossing_forward,
                                   static_argnames=("max_tile",))


def init_params(key):
    ks = jax.random.split(key, 8)
    scale = 0.05
    params = {
        "emb": scale * jax.random.normal(ks[0], (N_SPARSE, VOCAB, EMB_DIM), jnp.float32),
        "w1":  scale * jax.random.normal(ks[1], (N_BLOCKS, UNITS, HIDDEN), jnp.float32),
        "b1":  scale * jax.random.normal(ks[2], (N_BLOCKS, 1, HIDDEN), jnp.float32),
        "w2":  scale * jax.random.normal(ks[3], (N_BLOCKS, HIDDEN, UNITS), jnp.float32),
        "b2":  scale * jax.random.normal(ks[4], (N_BLOCKS, 1, UNITS), jnp.float32),
        "wo":  scale * jax.random.normal(ks[5], (UNITS, 1), jnp.float32),
        "bo":  scale * jax.random.normal(ks[6], (1, 1), jnp.float32),
    }
    return params


def reference_forward(dense_inputs, sparse_inputs, params):
    """Pure-JAX f32 reference matching the PyTorch module semantics."""
    emb_tables = params["emb"]
    embs = [emb_tables[i][sparse_inputs[:, i]] for i in range(N_SPARSE)]
    sparse_out = jnp.concatenate(embs, axis=1)
    x = jnp.concatenate([dense_inputs, sparse_out], axis=1)
    for i in range(N_BLOCKS):
        h = jnp.maximum(x @ params["w1"][i] + params["b1"][i], 0.0)
        y = h @ params["w2"][i] + params["b2"][i]
        x = jnp.maximum(x + y, 0.0)
    return jax.nn.sigmoid(x @ params["wo"] + params["bo"])


if __name__ == "__main__":
    key = jax.random.PRNGKey(0)
    k_param, k_dense, k_sparse = jax.random.split(key, 3)

    params = init_params(k_param)

    # Main small-shape check (B = 8): single tile, grid=(1,).
    B = 8
    dense_inputs = jax.random.normal(k_dense, (B, N_DENSE), jnp.float32)
    sparse_inputs = jax.random.randint(k_sparse, (B, N_SPARSE), 0, VOCAB, jnp.int32)

    out = deepcrossing_forward_jit(dense_inputs, sparse_inputs, params)
    out = jax.block_until_ready(out)
    ref = reference_forward(dense_inputs, sparse_inputs, params)
    assert out.shape == (B, 1)
    # bf16 streamed activations + bf16 MXU operands (f32 accumulation)
    # => loosen tolerance vs f32 reference.
    assert jnp.allclose(out, ref, atol=1e-2, rtol=1e-2)

    # Secondary check exercising ragged-batch padding and the >=2-grid-step
    # (megacore) path: B=37 -> TB=24, B_pad=48, grid=(2,).
    B2 = 37
    k_d2, k_s2 = jax.random.split(jax.random.PRNGKey(1))
    dense2 = jax.random.normal(k_d2, (B2, N_DENSE), jnp.float32)
    sparse2 = jax.random.randint(k_s2, (B2, N_SPARSE), 0, VOCAB, jnp.int32)
    out2 = jax.block_until_ready(deepcrossing_forward_jit(dense2, sparse2, params))
    ref2 = reference_forward(dense2, sparse2, params)
    assert out2.shape == (B2, 1)
    assert jnp.allclose(out2, ref2, atol=1e-2, rtol=1e-2)

    print("KERNEL_OK")
</pallas_src>

<mosaic_0001>
module attributes {stable_mosaic.version = 11 : i64} {
  func.func @deepcrossing_kernel(%arg0: i32, %arg1: memref<8x128xbf16, #tpu.memory_space<vmem>>, %arg2: memref<3x128x256xbf16, #tpu.memory_space<vmem>>, %arg3: memref<3x1x256xf32, #tpu.memory_space<vmem>>, %arg4: memref<3x256x128xbf16, #tpu.memory_space<vmem>>, %arg5: memref<3x1x128xf32, #tpu.memory_space<vmem>>, %arg6: memref<1x128xf32, #tpu.memory_space<vmem>>, %arg7: memref<1x1xf32, #tpu.memory_space<vmem>>, %arg8: memref<8x1xf32, #tpu.memory_space<vmem>>) attributes {dimension_semantics = [#tpu.dimension_semantics<parallel>], iteration_bounds = array<i64: 1>, scalar_prefetch = 0 : i64, scratch_operands = 0 : i64, tpu.core_type = #tpu.core_type<tc>, window_params = [{transform_indices = @transform_0, window_bounds = array<i64: 8, 128>}, {pipeline_mode = #tpu.pipeline_mode<synchronous>, transform_indices = @transform_1, window_bounds = array<i64: 3, 128, 256>}, {pipeline_mode = #tpu.pipeline_mode<synchronous>, transform_indices = @transform_2, window_bounds = array<i64: 3, 1, 256>}, {pipeline_mode = #tpu.pipeline_mode<synchronous>, transform_indices = @transform_3, window_bounds = array<i64: 3, 256, 128>}, {pipeline_mode = #tpu.pipeline_mode<synchronous>, transform_indices = @transform_4, window_bounds = array<i64: 3, 1, 128>}, {pipeline_mode = #tpu.pipeline_mode<synchronous>, transform_indices = @transform_5, window_bounds = array<i64: 1, 128>}, {pipeline_mode = #tpu.pipeline_mode<synchronous>, transform_indices = @transform_6, window_bounds = array<i64: 1, 1>}, {transform_indices = @transform_7, window_bounds = array<i64: 8, 1>}]} {
    %c0 = arith.constant 0 : index
    %c0_0 = arith.constant 0 : index
    %0 = vector.load %arg1[%c0, %c0_0] : memref<8x128xbf16, #tpu.memory_space<vmem>>, vector<8x128xbf16>
    %1 = arith.extf %0 : vector<8x128xbf16> to vector<8x128xf32>
    %c0_1 = arith.constant 0 : index
    %c0_2 = arith.constant 0 : index
    %c0_3 = arith.constant 0 : index
    %2 = vector.load %arg2[%c0_1, %c0_2, %c0_3] : memref<3x128x256xbf16, #tpu.memory_space<vmem>>, vector<1x128x256xbf16>
    %3 = vector.shape_cast %2 : vector<1x128x256xbf16> to vector<128x256xbf16>
    %cst = arith.constant dense<0.000000e+00> : vector<8x256xf32>
    %4 = tpu.matmul %0, %3, %cst {dimension_numbers = #tpu.dot_dimension_numbers<[1], [0], [0], [1], [0, 0, 1, 1], [], []>} : vector<8x128xbf16>, vector<128x256xbf16>, vector<8x256xf32> -> vector<8x256xf32>
    %c0_4 = arith.constant 0 : index
    %c0_5 = arith.constant 0 : index
    %c0_6 = arith.constant 0 : index
    %5 = vector.load %arg3[%c0_4, %c0_5, %c0_6] : memref<3x1x256xf32, #tpu.memory_space<vmem>>, vector<1x1x256xf32>
    %6 = vector.shape_cast %5 : vector<1x1x256xf32> to vector<1x256xf32>
    %7 = vector.broadcast %6 : vector<1x256xf32> to vector<8x256xf32>
    %8 = arith.addf %4, %7 : vector<8x256xf32>
    %cst_7 = arith.constant 0.000000e+00 : f32
    %9 = vector.broadcast %cst_7 : f32 to vector<8x256xf32>
    %10 = arith.maximumf %8, %9 : vector<8x256xf32>
    %11 = arith.truncf %10 : vector<8x256xf32> to vector<8x256xbf16>
    %c0_8 = arith.constant 0 : index
    %c0_9 = arith.constant 0 : index
    %c0_10 = arith.constant 0 : index
    %12 = vector.load %arg4[%c0_8, %c0_9, %c0_10] : memref<3x256x128xbf16, #tpu.memory_space<vmem>>, vector<1x256x128xbf16>
    %13 = vector.shape_cast %12 : vector<1x256x128xbf16> to vector<256x128xbf16>
    %cst_11 = arith.constant dense<0.000000e+00> : vector<8x128xf32>
    %14 = tpu.matmul %11, %13, %cst_11 {dimension_numbers = #tpu.dot_dimension_numbers<[1], [0], [0], [1], [0, 0, 1, 1], [], []>} : vector<8x256xbf16>, vector<256x128xbf16>, vector<8x128xf32> -> vector<8x128xf32>
    %c0_12 = arith.constant 0 : index
    %c0_13 = arith.constant 0 : index
    %c0_14 = arith.constant 0 : index
    %15 = vector.load %arg5[%c0_12, %c0_13, %c0_14] : memref<3x1x128xf32, #tpu.memory_space<vmem>>, vector<1x1x128xf32>
    %16 = vector.shape_cast %15 : vector<1x1x128xf32> to vector<1x128xf32>
    %17 = vector.broadcast %16 : vector<1x128xf32> to vector<8x128xf32>
    %18 = arith.addf %14, %17 : vector<8x128xf32>
    %19 = arith.addf %1, %18 : vector<8x128xf32>
    %cst_15 = arith.constant 0.000000e+00 : f32
    %20 = vector.broadcast %cst_15 : f32 to vector<8x128xf32>
    %21 = arith.maximumf %19, %20 : vector<8x128xf32>
    %22 = arith.truncf %21 : vector<8x128xf32> to vector<8x128xbf16>
    %c1 = arith.constant 1 : index
    %c0_16 = arith.constant 0 : index
    %c0_17 = arith.constant 0 : index
    %23 = vector.load %arg2[%c1, %c0_16, %c0_17] : memref<3x128x256xbf16, #tpu.memory_space<vmem>>, vector<1x128x256xbf16>
    %24 = vector.shape_cast %23 : vector<1x128x256xbf16> to vector<128x256xbf16>
    %cst_18 = arith.constant dense<0.000000e+00> : vector<8x256xf32>
    %25 = tpu.matmul %22, %24, %cst_18 {dimension_numbers = #tpu.dot_dimension_numbers<[1], [0], [0], [1], [0, 0, 1, 1], [], []>} : vector<8x128xbf16>, vector<128x256xbf16>, vector<8x256xf32> -> vector<8x256xf32>
    %c1_19 = arith.constant 1 : index
    %c0_20 = arith.constant 0 : index
    %c0_21 = arith.constant 0 : index
    %26 = vector.load %arg3[%c1_19, %c0_20, %c0_21] : memref<3x1x256xf32, #tpu.memory_space<vmem>>, vector<1x1x256xf32>
    %27 = vector.shape_cast %26 : vector<1x1x256xf32> to vector<1x256xf32>
    %28 = vector.broadcast %27 : vector<1x256xf32> to vector<8x256xf32>
    %29 = arith.addf %25, %28 : vector<8x256xf32>
    %cst_22 = arith.constant 0.000000e+00 : f32
    %30 = vector.broadcast %cst_22 : f32 to vector<8x256xf32>
    %31 = arith.maximumf %29, %30 : vector<8x256xf32>
    %32 = arith.truncf %31 : vector<8x256xf32> to vector<8x256xbf16>
    %c1_23 = arith.constant 1 : index
    %c0_24 = arith.constant 0 : index
    %c0_25 = arith.constant 0 : index
    %33 = vector.load %arg4[%c1_23, %c0_24, %c0_25] : memref<3x256x128xbf16, #tpu.memory_space<vmem>>, vector<1x256x128xbf16>
    %34 = vector.shape_cast %33 : vector<1x256x128xbf16> to vector<256x128xbf16>
    %cst_26 = arith.constant dense<0.000000e+00> : vector<8x128xf32>
    %35 = tpu.matmul %32, %34, %cst_26 {dimension_numbers = #tpu.dot_dimension_numbers<[1], [0], [0], [1], [0, 0, 1, 1], [], []>} : vector<8x256xbf16>, vector<256x128xbf16>, vector<8x128xf32> -> vector<8x128xf32>
    %c1_27 = arith.constant 1 : index
    %c0_28 = arith.constant 0 : index
    %c0_29 = arith.constant 0 : index
    %36 = vector.load %arg5[%c1_27, %c0_28, %c0_29] : memref<3x1x128xf32, #tpu.memory_space<vmem>>, vector<1x1x128xf32>
    %37 = vector.shape_cast %36 : vector<1x1x128xf32> to vector<1x128xf32>
    %38 = vector.broadcast %37 : vector<1x128xf32> to vector<8x128xf32>
    %39 = arith.addf %35, %38 : vector<8x128xf32>
    %40 = arith.addf %21, %39 : vector<8x128xf32>
    %cst_30 = arith.constant 0.000000e+00 : f32
    %41 = vector.broadcast %cst_30 : f32 to vector<8x128xf32>
    %42 = arith.maximumf %40, %41 : vector<8x128xf32>
    %43 = arith.truncf %42 : vector<8x128xf32> to vector<8x128xbf16>
    %c2 = arith.constant 2 : index
    %c0_31 = arith.constant 0 : index
    %c0_32 = arith.constant 0 : index
    %44 = vector.load %arg2[%c2, %c0_31, %c0_32] : memref<3x128x256xbf16, #tpu.memory_space<vmem>>, vector<1x128x256xbf16>
    %45 = vector.shape_cast %44 : vector<1x128x256xbf16> to vector<128x256xbf16>
    %cst_33 = arith.constant dense<0.000000e+00> : vector<8x256xf32>
    %46 = tpu.matmul %43, %45, %cst_33 {dimension_numbers = #tpu.dot_dimension_numbers<[1], [0], [0], [1], [0, 0, 1, 1], [], []>} : vector<8x128xbf16>, vector<128x256xbf16>, vector<8x256xf32> -> vector<8x256xf32>
    %c2_34 = arith.constant 2 : index
    %c0_35 = arith.constant 0 : index
    %c0_36 = arith.constant 0 : index
    %47 = vector.load %arg3[%c2_34, %c0_35, %c0_36] : memref<3x1x256xf32, #tpu.memory_space<vmem>>, vector<1x1x256xf32>
    %48 = vector.shape_cast %47 : vector<1x1x256xf32> to vector<1x256xf32>
    %49 = vector.broadcast %48 : vector<1x256xf32> to vector<8x256xf32>
    %50 = arith.addf %46, %49 : vector<8x256xf32>
    %cst_37 = arith.constant 0.000000e+00 : f32
    %51 = vector.broadcast %cst_37 : f32 to vector<8x256xf32>
    %52 = arith.maximumf %50, %51 : vector<8x256xf32>
    %53 = arith.truncf %52 : vector<8x256xf32> to vector<8x256xbf16>
    %c2_38 = arith.constant 2 : index
    %c0_39 = arith.constant 0 : index
    %c0_40 = arith.constant 0 : index
    %54 = vector.load %arg4[%c2_38, %c0_39, %c0_40] : memref<3x256x128xbf16, #tpu.memory_space<vmem>>, vector<1x256x128xbf16>
    %55 = vector.shape_cast %54 : vector<1x256x128xbf16> to vector<256x128xbf16>
    %cst_41 = arith.constant dense<0.000000e+00> : vector<8x128xf32>
    %56 = tpu.matmul %53, %55, %cst_41 {dimension_numbers = #tpu.dot_dimension_numbers<[1], [0], [0], [1], [0, 0, 1, 1], [], []>} : vector<8x256xbf16>, vector<256x128xbf16>, vector<8x128xf32> -> vector<8x128xf32>
    %c2_42 = arith.constant 2 : index
    %c0_43 = arith.constant 0 : index
    %c0_44 = arith.constant 0 : index
    %57 = vector.load %arg5[%c2_42, %c0_43, %c0_44] : memref<3x1x128xf32, #tpu.memory_space<vmem>>, vector<1x1x128xf32>
    %58 = vector.shape_cast %57 : vector<1x1x128xf32> to vector<1x128xf32>
    %59 = vector.broadcast %58 : vector<1x128xf32> to vector<8x128xf32>
    %60 = arith.addf %56, %59 : vector<8x128xf32>
    %61 = arith.addf %42, %60 : vector<8x128xf32>
    %cst_45 = arith.constant 0.000000e+00 : f32
    %62 = vector.broadcast %cst_45 : f32 to vector<8x128xf32>
    %63 = arith.maximumf %61, %62 : vector<8x128xf32>
    %c0_46 = arith.constant 0 : index
    %c0_47 = arith.constant 0 : index
    %64 = vector.load %arg6[%c0_46, %c0_47] : memref<1x128xf32, #tpu.memory_space<vmem>>, vector<1x128xf32>
    %65 = vector.broadcast %64 : vector<1x128xf32> to vector<8x128xf32>
    %66 = arith.mulf %63, %65 : vector<8x128xf32>
    %cst_48 = arith.constant dense<0.000000e+00> : vector<8xf32>
    %67 = vector.multi_reduction <add>, %66, %cst_48 [1] : vector<8x128xf32> to vector<8xf32>
    %68 = vector.shape_cast %67 : vector<8xf32> to vector<8x1xf32>
    %c0_49 = arith.constant 0 : index
    %c0_50 = arith.constant 0 : index
    %69 = vector.load %arg7[%c0_49, %c0_50] : memref<1x1xf32, #tpu.memory_space<vmem>>, vector<1x1xf32>
    %70 = vector.broadcast %69 : vector<1x1xf32> to vector<8x1xf32>
    %71 = arith.addf %68, %70 : vector<8x1xf32>
    %72 = arith.negf %71 : vector<8x1xf32>
    %73 = math.exp %72 : vector<8x1xf32>
    %cst_51 = arith.constant 1.000000e+00 : f32
    %74 = vector.broadcast %cst_51 : f32 to vector<8x1xf32>
    %75 = arith.addf %74, %73 : vector<8x1xf32>
    %76 = arith.divf %74, %75 : vector<8x1xf32>
    %c0_52 = arith.constant 0 : index
    %c0_53 = arith.constant 0 : index
    %77 = vector.load %arg8[%c0_52, %c0_53] : memref<8x1xf32, #tpu.memory_space<vmem>>, vector<8x1xf32>
    tpu.vector_store %arg8[%c0_52, %c0_53], %76 {strides = array<i32>} : memref<8x1xf32, #tpu.memory_space<vmem>>, vector<8x1xf32>,
    return
  }
  func.func @transform_0(%arg0: i32) -> (i32, i32) {
    %c0_i32 = arith.constant 0 : i32
    %c0_i32_0 = arith.constant 0 : i32
    return %arg0, %c0_i32 : i32, i32
  }
  func.func @transform_1(%arg0: i32) -> (i32, i32, i32) {
    %c0_i32 = arith.constant 0 : i32
    %c0_i32_0 = arith.constant 0 : i32
    %c0_i32_1 = arith.constant 0 : i32
    %c0_i32_2 = arith.constant 0 : i32
    return %c0_i32, %c0_i32_0, %c0_i32_1 : i32, i32, i32
  }
  func.func @transform_2(%arg0: i32) -> (i32, i32, i32) {
    %c0_i32 = arith.constant 0 : i32
    %c0_i32_0 = arith.constant 0 : i32
    %c0_i32_1 = arith.constant 0 : i32
    %c0_i32_2 = arith.constant 0 : i32
    return %c0_i32, %c0_i32_0, %c0_i32_1 : i32, i32, i32
  }
  func.func @transform_3(%arg0: i32) -> (i32, i32, i32) {
    %c0_i32 = arith.constant 0 : i32
    %c0_i32_0 = arith.constant 0 : i32
    %c0_i32_1 = arith.constant 0 : i32
    %c0_i32_2 = arith.constant 0 : i32
    return %c0_i32, %c0_i32_0, %c0_i32_1 : i32, i32, i32
  }
  func.func @transform_4(%arg0: i32) -> (i32, i32, i32) {
    %c0_i32 = arith.constant 0 : i32
    %c0_i32_0 = arith.constant 0 : i32
    %c0_i32_1 = arith.constant 0 : i32
    %c0_i32_2 = arith.constant 0 : i32
    return %c0_i32, %c0_i32_0, %c0_i32_1 : i32, i32, i32
  }
  func.func @transform_5(%arg0: i32) -> (i32, i32) {
    %c0_i32 = arith.constant 0 : i32
    %c0_i32_0 = arith.constant 0 : i32
    %c0_i32_1 = arith.constant 0 : i32
    return %c0_i32, %c0_i32_0 : i32, i32
  }
  func.func @transform_6(%arg0: i32) -> (i32, i32) {
    %c0_i32 = arith.constant 0 : i32
    %c0_i32_0 = arith.constant 0 : i32
    %c0_i32_1 = arith.constant 0 : i32
    return %c0_i32, %c0_i32_0 : i32, i32
  }
  func.func @transform_7(%arg0: i32) -> (i32, i32) {
    %c0_i32 = arith.constant 0 : i32
    %c0_i32_0 = arith.constant 0 : i32
    return %arg0, %c0_i32 : i32, i32
  }
}

</mosaic_0001>

<bundles_post_ra>
// kernel: deepcrossing_forward.1
= control target key start
LH: loop header
LB: loop body
LE: loop exit
PB: predicated region body
PF: predicated region fallthrough
CT: control target
= control target key end

     0   :  { %v1454_v1 = vmov 0   ;;  %v49_v44 = vlaneseq  ;;  %vm1055_vm0 = vcmask 7168   ;;  %s1835_s1 = inlined_call_operand.vmem [shape: bf16[3,128,256], index: 1, kind: input, shape index: {}]   ;;  %s1836_s3 = inlined_call_operand.vmem [shape: bf16[3,256,128], index: 3, kind: input, shape index: {}]   ;;  %s1837_s0 = inlined_call_operand.vmem [shape: bf16[8,128], index: 0, kind: input, shape index: {}]   ;;  %s1838_s2 = inlined_call_operand.vmem [shape: f32[3,1,256], index: 2, kind: input, shape index: {}]   ;;  %s1839_s4 = inlined_call_operand.vmem [shape: f32[3,1,128], index: 4, kind: input, shape index: {}]   ;;  %s1840_s6 = inlined_call_operand.<no memory space> [shape: f32[1,1], index: 6, kind: input, shape index: {}]   ;;  %s1841_s5 = inlined_call_operand.vmem [shape: f32[1,128], index: 5, kind: input, shape index: {}]   ;;  %s1842_s7 = inlined_call_operand.vmem [shape: f32[8,1], index: 7, kind: output, shape index: {}]  }
   0x1   :  { %v1330_v0 = vld [vmem:[%s1835_s1 + $0x74] ss:$8 sps:$4 sm:$0xff]   ;;  %171 = vmatprep.mubr.bf16.mxu0 %v1454_v1  ;;  %v1332_v2 = vld [vmem:[%s1835_s1 + $0x70] ss:$8 sps:$4 sm:$0xff]   ;;  %v1333_v3 = vld [vmem:[%s1835_s1 + $0x64] ss:$8 sps:$4 sm:$0xff]  }
   0x2   :  { %139 = vmatprep.subr.bf16.mxu0 %v1330_v0  ;;  %v1335_v4 = vld [vmem:[%s1835_s1 + $0x60] ss:$8 sps:$4 sm:$0xff]   ;;  %v1336_v5 = vld [vmem:[%s1835_s1 + $0x54] ss:$8 sps:$4 sm:$0xff]   ;;  %v1338_v6 = vld [vmem:[%s1835_s1 + $0x50] ss:$8 sps:$4 sm:$0xff]  }
   0x3   :  { %140 = vmatpush1.bf16.msra.mxu0 %v1332_v2  ;;  %v1339_v7 = vld [vmem:[%s1835_s1 + $0x44] ss:$8 sps:$4 sm:$0xff]   ;;  %v1341_v8 = vld [vmem:[%s1835_s1 + $0x40] ss:$8 sps:$4 sm:$0xff]   ;;  %v1342_v9 = vld [vmem:[%s1835_s1 + $0x34] ss:$8 sps:$4 sm:$0xff]  }
   0x4   :  { %141 = vmatprep.subr.bf16.mxu0 %v1333_v3  ;;  %v1354_v10 = vld [vmem:[%s1836_s3 + $0x78] sm:$0xff]   ;;  %v1356_v13 = vld [vmem:[%s1836_s3 + $0x70] sm:$0xff]   ;;  %v1358_v15 = vld [vmem:[%s1836_s3 + $0x68] sm:$0xff]   ;;  %v50_v45 = vshrl.u32 %v49_v44, 7 }
   0x5   :  { %v1355_v11 = vld [vmem:[%s1836_s3 + $0x38] sm:$0xff]   ;;  %1263 = vmatprep.subr.bf16.mxu1 %v1354_v10  ;;  %v1357_v14 = vld [vmem:[%s1836_s3 + $0x30] sm:$0xff]   ;;  %v1345_v16 = vld [vmem:[%s1835_s1 + $0x24] ss:$8 sps:$4 sm:$0xff]  }
   0x6   :  { %v1344_v12 = vld [vmem:[%s1835_s1 + $0x30] ss:$8 sps:$4 sm:$0xff]   ;;  %1264 = vmatpush3.bf16.msra.mxu1 %v1355_v11  ;;  %v1347_v17 = vld [vmem:[%s1835_s1 + $0x20] ss:$8 sps:$4 sm:$0xff]   ;;  %v1348_v20 = vld [vmem:[%s1835_s1 + $0x14] ss:$8 sps:$4 sm:$0xff]  }
   0x7   :  { %142 = vmatpush1.bf16.msra.mxu0 %v1335_v4  ;;  %1265 = vmatprep.subr.bf16.mxu1 %v1356_v13  ;;  %v1359_v18 = vld [vmem:[%s1836_s3 + $0x28] sm:$0xff]   ;;  %v1360_v19 = vld [vmem:[%s1836_s3 + $0x60] sm:$0xff]   ;;  %v1350_v21 = vld [vmem:[%s1835_s1 + $0x10] ss:$8 sps:$4 sm:$0xff]   ;;  %v1629_v46 = vsub.s32 0, %v50_v45  ;;  %v1634_v48 = vsub.s32 1, %v50_v45 }
   0x8   :  { %143 = vmatprep.subr.bf16.mxu0 %v1336_v5  ;;  %v1351_v22 = vld [vmem:[%s1835_s1 + $0x4] ss:$8 sps:$4 sm:$0xff]   ;;  %v1362_v24 = vld [vmem:[%s1836_s3 + $0x58] sm:$0xff]   ;;  %v1353_v26 = vld [vmem:[%s1835_s1] ss:$8 sps:$4 sm:$0xff]  }
   0x9   :  { %v1361_v23 = vld [vmem:[%s1836_s3 + $0x20] sm:$0xff]   ;;  %v1363_v25 = vld [vmem:[%s1836_s3 + $0x18] sm:$0xff]   ;;  %v1364_v27 = vld [vmem:[%s1836_s3 + $0x50] sm:$0xff]  }
   0xa   :  { %1266 = vmatpush3.bf16.msra.mxu1 %v1357_v14  ;;  %v1365_v28 = vld [vmem:[%s1836_s3 + $0x10] sm:$0xff]   ;;  %v1583_v29 = vld [vmem:[%s1837_s0] sm:$0xf]  ;;  %v1366_v30 = vld [vmem:[%s1836_s3 + $0x48] sm:$0xff]  }
   0xb   :  { %144 = vmatpush1.bf16.msra.mxu0 %v1338_v6  ;;  %1267 = vmatprep.subr.bf16.mxu1 %v1358_v15  ;;  %v1367_v31 = vld [vmem:[%s1836_s3 + $0x8] sm:$0xff]   ;;  %v1368_v32 = vld [vmem:[%s1836_s3 + $0x40] sm:$0xff]   ;;  %v1370_v34 = vld [vmem:[%s1835_s1 + $0xf0] ss:$8 sps:$4 sm:$0xff]  }
   0xc   :  { %145 = vmatprep.subr.bf16.mxu0 %v1339_v7  ;;  %v1369_v33 = vld [vmem:[%s1836_s3] sm:$0xff]   ;;  %v1372_v35 = vld [vmem:[%s1835_s1 + $0xf4] ss:$8 sps:$4 sm:$0xff]   ;;  %v1376_v39 = vld [vmem:[%s1835_s1 + $0xd0] ss:$8 sps:$4 sm:$0xff]  }
   0xd   :  { %v1375_v36 = vld [vmem:[%s1835_s1 + $0xe4] ss:$8 sps:$4 sm:$0xff]   ;;  %v1373_v37 = vld [vmem:[%s1835_s1 + $0xe0] ss:$8 sps:$4 sm:$0xff]   ;;  %v1378_v38 = vld [vmem:[%s1835_s1 + $0xd4] ss:$8 sps:$4 sm:$0xff]  }
   0xe   :  { %1268 = vmatpush3.bf16.msra.mxu1 %v1359_v18  ;;  %v1381_v40 = vld [vmem:[%s1835_s1 + $0xc4] ss:$8 sps:$4 sm:$0xff]   ;;  %v1379_v41 = vld [vmem:[%s1835_s1 + $0xc0] ss:$8 sps:$4 sm:$0xff]   ;;  %v1384_v42 = vld [vmem:[%s1835_s1 + $0xb4] ss:$8 sps:$4 sm:$0xff]  }
   0xf   :  { %146 = vmatpush1.bf16.msra.mxu0 %v1341_v8  ;;  %1269 = vmatprep.subr.bf16.mxu1 %v1360_v19  ;;  %v1382_v43 = vld [vmem:[%s1835_s1 + $0xb0] ss:$8 sps:$4 sm:$0xff]   ;;  %v47_v47 = vld [vmem:[%s1838_s2] sm:$0x3]  ;;  %v1387_v61 = vld [vmem:[%s1835_s1 + $0xa4] ss:$8 sps:$4 sm:$0xff]   ;;  %v30_v19 = vunpack.c.l.bf16 %v1583_v29 }
  0x10   :  { %147 = vmatprep.subr.bf16.mxu0 %v1342_v9  ;;  %v52_v49 = vrot.slane %v47_v47, %v1629_v46  ;;  %v56_v50 = vrot.slane %v47_v47, %v1634_v48  ;;  %v1385_v62 = vld [vmem:[%s1835_s1 + $0xa0] ss:$8 sps:$4 sm:$0xff]   ;;  %v1390_v63 = vld [vmem:[%s1835_s1 + $0x94] ss:$8 sps:$4 sm:$0xff]   ;;  %v1388_v0 = vld [vmem:[%s1835_s1 + $0x90] ss:$8 sps:$4 sm:$0xff]  }
  0x11   :  { %v1393_v2 = vld [vmem:[%s1835_s1 + $0x84] ss:$8 sps:$4 sm:$0xff]   ;;  %v1391_v3 = vld [vmem:[%s1835_s1 + $0x80] ss:$8 sps:$4 sm:$0xff]   ;;  %v1394_v4 = vld [vmem:[%s1836_s3 + $0xf8] sm:$0xff]  }
  0x12   :  { %1270 = vmatpush3.bf16.msra.mxu1 %v1361_v23  ;;  %v1395_v5 = vld [vmem:[%s1836_s3 + $0xb8] sm:$0xff]   ;;  %v1396_v6 = vld [vmem:[%s1836_s3 + $0xf0] sm:$0xff]   ;;  %v1398_v8 = vld [vmem:[%s1836_s3 + $0xe8] sm:$0xff]  }
  0x13   :  { %148 = vmatpush1.bf16.msra.mxu0 %v1344_v12  ;;  %1271 = vmatprep.subr.bf16.mxu1 %v1362_v24  ;;  %v1397_v7 = vld [vmem:[%s1836_s3 + $0xb0] sm:$0xff]   ;;  %v1399_v9 = vld [vmem:[%s1836_s3 + $0xa8] sm:$0xff]   ;;  %v1400_v10 = vld [vmem:[%s1836_s3 + $0xe0] sm:$0xff]  }
  0x14   :  { %149 = vmatprep.subr.bf16.mxu0 %v1345_v16  ;;  %v1401_v11 = vld [vmem:[%s1836_s3 + $0xa0] sm:$0xff]   ;;  %v1402_v12 = vld [vmem:[%s1836_s3 + $0xd8] sm:$0xff]   ;;  %v1404_v14 = vld [vmem:[%s1836_s3 + $0xd0] sm:$0xff]  }
  0x15   :  { %v1403_v13 = vld [vmem:[%s1836_s3 + $0x98] sm:$0xff]   ;;  %v1405_v15 = vld [vmem:[%s1836_s3 + $0x90] sm:$0xff]  }
  0x16   :  { %1272 = vmatpush3.bf16.msra.mxu1 %v1363_v25 }
  0x17   :  { %150 = vmatpush1.bf16.msra.mxu0 %v1347_v17  ;;  %1273 = vmatprep.subr.bf16.mxu1 %v1364_v27  ;;  %v1077_v17 = vld [vmem:[%s1839_s4] ss:$0 sm:$0xff]  ;;  %v1406_v27 = vld [vmem:[%s1836_s3 + $0xc8] sm:$0xff]  }
  0x18   :  { %151 = vmatprep.subr.bf16.mxu0 %v1348_v20 }
  0x1a   :  { %1274 = vmatpush3.bf16.msra.mxu1 %v1365_v28  ;;  %v1407_v28 = vld [vmem:[%s1836_s3 + $0x88] sm:$0xff]  }
  0x1b   :  { %152 = vmatpush1.bf16.msra.mxu0 %v1350_v21  ;;  %1275 = vmatprep.subr.bf16.mxu1 %v1366_v30  ;;  %v1409_v30 = vld [vmem:[%s1836_s3 + $0x80] sm:$0xff]  }
  0x1c   :  { %153 = vmatprep.subr.bf16.mxu0 %v1351_v22 }
  0x1e   :  { %1276 = vmatpush3.bf16.msra.mxu1 %v1367_v31  ;;  %v1412_v31 = vld [vmem:[%s1835_s1 + $0x174] ss:$8 sps:$4 sm:$0xff]  }
  0x1f   :  { %154 = vmatpush1.bf16.msra.mxu0 %v1353_v26  ;;  %1277 = vmatprep.subr.bf16.mxu1 %v1368_v32  ;;  %v1415_v32 = vld [vmem:[%s1835_s1 + $0x164] ss:$8 sps:$4 sm:$0xff]  }
  0x20   :  { %472 = vmatprep.subr.bf16.mxu0 %v1372_v35  ;;  %v1416_v35 = vld [vmem:[%s1835_s1 + $0x150] ss:$8 sps:$4 sm:$0xff]  }
  0x22   :  { %172 = vmatmul.mubr.bf16.vlgmr.msra.gmra.mxu0 %v1583_v29  ;;  %1278 = vmatpush3.bf16.msra.mxu1 %v1369_v33  ;;  %v1408_v29 = vld [vmem:[%s1836_s3 + $0xc0] sm:$0xff]  }
  0x23   :  { %504 = vmatprep.mubr.bf16.mxu0 %v1454_v1  ;;  %473 = vmatpush1.bf16.msra.mxu0 %v1370_v34  ;;  %v1413_v33 = vld [vmem:[%s1835_s1 + $0x160] ss:$8 sps:$4 sm:$0xff]   ;;  %v1418_v34 = vld [vmem:[%s1835_s1 + $0x154] ss:$8 sps:$4 sm:$0xff]  }
  0x24   :  { %474 = vmatprep.subr.bf16.mxu0 %v1375_v36  ;;  %1285 = vmatprep.subr.bf16.mxu1 %v1394_v4  ;;  %v1421_v36 = vld [vmem:[%s1835_s1 + $0x144] ss:$8 sps:$4 sm:$0xff]  }
  0x25   :  { %v1440_v4 = vld [vmem:[%s1836_s3 + $0x160] sm:$0xff]  }
  0x27   :  { %475 = vmatpush1.bf16.msra.mxu0 %v1373_v37  ;;  %v1419_v37 = vld [vmem:[%s1835_s1 + $0x140] ss:$8 sps:$4 sm:$0xff]  }
  0x28   :  { %476 = vmatprep.subr.bf16.mxu0 %v1378_v38  ;;  %v1424_v38 = vld [vmem:[%s1835_s1 + $0x134] ss:$8 sps:$4 sm:$0xff]  }
  0x2b   :  { %477 = vmatpush1.bf16.msra.mxu0 %v1376_v39  ;;  %v1422_v39 = vld [vmem:[%s1835_s1 + $0x130] ss:$8 sps:$4 sm:$0xff]  }
  0x2c   :  { %478 = vmatprep.subr.bf16.mxu0 %v1381_v40  ;;  %v1110_v40 = vld [vmem:[%s1838_s2 + $0x2] sm:$0x3] }
  0x2f   :  { %479 = vmatpush1.bf16.msra.mxu0 %v1379_v41  ;;  %v385_v41 = vrot.slane %v1110_v40, %v1629_v46 }
  0x30   :  { %480 = vmatprep.subr.bf16.mxu0 %v1384_v42  ;;  %v389_v42 = vrot.slane %v1110_v40, %v1634_v48 }
  0x33   :  { %481 = vmatpush1.bf16.msra.mxu0 %v1382_v43 }
  0x34   :  { %482 = vmatprep.subr.bf16.mxu0 %v1387_v61  ;;  %v1434_v61 = vld [vmem:[%s1836_s3 + $0x178] sm:$0xff]  }
  0x37   :  { %483 = vmatpush1.bf16.msra.mxu0 %v1385_v62  ;;  %v1435_v62 = vld [vmem:[%s1836_s3 + $0x138] sm:$0xff]  }
  0x38   :  { %484 = vmatprep.subr.bf16.mxu0 %v1390_v63  ;;  %v1436_v63 = vld [vmem:[%s1836_s3 + $0x170] sm:$0xff]  }
  0x3b   :  { %485 = vmatpush1.bf16.msra.mxu0 %v1388_v0  ;;  %v1437_v0 = vld [vmem:[%s1836_s3 + $0x130] sm:$0xff]  }
  0x3c   :  { %486 = vmatprep.subr.bf16.mxu0 %v1393_v2  ;;  %v1438_v2 = vld [vmem:[%s1836_s3 + $0x168] sm:$0xff]  }
  0x3f   :  { %487 = vmatpush1.bf16.msra.mxu0 %v1391_v3  ;;  %v1439_v3 = vld [vmem:[%s1836_s3 + $0x128] sm:$0xff]  }
  0x40   :  { %807 = vmatprep.subr.bf16.mxu0 %v1412_v31 }
  0xe2   :  { %v173_v51 = vpop.f32.mrf.mxu0 }
  0xe3   :  { %v174_v52 = vadd.f32 %v173_v51, %v52_v49 }
  0xe4   :  { %v175_v53 = vpop.f32.mrf.mxu0 }
  0xe5   :  { %v176_v54 = vadd.f32 %v175_v53, %v56_v50  ;;  %v180_v55 = vmax.f32 %v174_v52, 0.0 }
  0xe6   :  { %v177_v56 = vpop.f32.mrf.mxu0 }
  0xe7   :  { %v181_v57 = vmax.f32 %v176_v54, 0.0  ;;  %v182_v60 = vpack.c.bf16 %v180_v55, %v180_v55  ;;  %v1427_v55 = vld [vmem:[%s1835_s1 + $0x124] ss:$8 sps:$4 sm:$0xff]   ;;  %v1425_v56 = vld [vmem:[%s1835_s1 + $0x120] ss:$8 sps:$4 sm:$0xff]  }
  0xe8   :  { %v178_v58 = vpop.f32.mrf.mxu0 }
  0xe9   :  { %v183_v59 = vpack.c.bf16 %v181_v57, %v181_v57  ;;  %v1430_v57 = vld [vmem:[%s1835_s1 + $0x114] ss:$8 sps:$4 sm:$0xff]   ;;  %v1428_v58 = vld [vmem:[%s1835_s1 + $0x110] ss:$8 sps:$4 sm:$0xff]  }
  0xeb   :  { %351 = vmatprep.mubr.bf16.mxu1 %v183_v59  ;;  %v1433_v59 = vld [vmem:[%s1835_s1 + $0x104] ss:$8 sps:$4 sm:$0xff]  }
  0xec   :  { %352 = vmatmul.mubr.bf16.vlgmr.msra.gmra.mxu1 %v182_v60  ;;  %v1431_v60 = vld [vmem:[%s1835_s1 + $0x100] ss:$8 sps:$4 sm:$0xff]  }
  0xed   :  { %1286 = vmatpush3.bf16.msra.mxu1 %v1395_v5  ;;  %v1441_v5 = vld [vmem:[%s1836_s3 + $0x120] sm:$0xff]  }
  0xee   :  { %1287 = vmatprep.subr.bf16.mxu1 %v1396_v6  ;;  %v1442_v6 = vld [vmem:[%s1836_s3 + $0x158] sm:$0xff]  }
  0xf1   :  { %1288 = vmatpush3.bf16.msra.mxu1 %v1397_v7  ;;  %v1443_v7 = vld [vmem:[%s1836_s3 + $0x118] sm:$0xff]  }
  0xf2   :  { %1289 = vmatprep.subr.bf16.mxu1 %v1398_v8  ;;  %v1444_v8 = vld [vmem:[%s1836_s3 + $0x150] sm:$0xff]  }
  0xf5   :  { %1290 = vmatpush3.bf16.msra.mxu1 %v1399_v9  ;;  %v1445_v9 = vld [vmem:[%s1836_s3 + $0x110] sm:$0xff]  }
  0xf6   :  { %1291 = vmatprep.subr.bf16.mxu1 %v1400_v10 }
  0xf9   :  { %1292 = vmatpush3.bf16.msra.mxu1 %v1401_v11  ;;  %v1160_v11 = vld [vmem:[%s1839_s4 + $0x1] ss:$0 sm:$0xff] }
  0xfa   :  { %1293 = vmatprep.subr.bf16.mxu1 %v1402_v12 }
  0xfd   :  { %1294 = vmatpush3.bf16.msra.mxu1 %v1403_v13 }
  0xfe   :  { %1295 = vmatprep.subr.bf16.mxu1 %v1404_v14 }
 0x101   :  { %1296 = vmatpush3.bf16.msra.mxu1 %v1405_v15 }
 0x102   :  { %1297 = vmatprep.subr.bf16.mxu1 %v1406_v27 }
 0x105   :  { %1298 = vmatpush3.bf16.msra.mxu1 %v1407_v28 }
 0x106   :  { %1299 = vmatprep.subr.bf16.mxu1 %v1408_v29 }
 0x109   :  { %1300 = vmatpush3.bf16.msra.mxu1 %v1409_v30 }
 0x10a   :  { %1307 = vmatprep.subr.bf16.mxu1 %v1434_v61 }
 0x1ac   :  { %v1279_v16 = vpop.f32.mrf.mxu1 }
 0x1ae   :  { %v1280_v18 = vpop.f32.mrf.mxu1 }
 0x1af   :  { %v1281_v20 = vadd.f32 %v1280_v18, %v1279_v16 }
 0x1b0   :  { %v1282_v21 = vpop.f32.mrf.mxu1 }
 0x1b1   :  { %v354_v22 = vadd.f32 %v1281_v20, %v1077_v17  ;;  %v1446_v20 = vld [vmem:[%s1836_s3 + $0x148] sm:$0xff]  }
 0x1b2   :  { %v1283_v23 = vpop.f32.mrf.mxu1  ;;  %v1447_v21 = vld [vmem:[%s1836_s3 + $0x108] sm:$0xff]  }
 0x1b3   :  { %v359_v24 = vadd.f32 %v354_v22, %v30_v19  ;;  %v1448_v22 = vld [vmem:[%s1836_s3 + $0x140] sm:$0xff]  }
 0x1b4   :  { %v1449_v23 = vld [vmem:[%s1836_s3 + $0x100] sm:$0xff]  }
 0x1b5   :  { %v1696_v25 = vmax.f32 %v359_v24, 0.0  ;;  %v1193_v24 = vld [vmem:[%s1838_s2 + $0x4] sm:$0x3] }
 0x1b7   :  { %v361_v26 = vpack.c.bf16 %v1696_v25, %v1696_v25 }
 0x1b9   :  { %505 = vmatmul.mubr.bf16.vlgmr.msra.gmra.mxu0 %v361_v26  ;;  %v724_v26 = vrot.slane %v1193_v24, %v1634_v48  ;;  %v1243_v48 = vld [vmem:[%s1839_s4 + $0x2] ss:$0 sm:$0xff] }
 0x1ba   :  { %839 = vmatprep.mubr.bf16.mxu0 %v1454_v1  ;;  %v1410_v1 = vld [vmem:[%s1835_s1 + $0x170] ss:$8 sps:$4 sm:$0xff]  }
 0x1bb   :  { %808 = vmatpush1.bf16.msra.mxu0 %v1410_v1 }
 0x1bc   :  { %809 = vmatprep.subr.bf16.mxu0 %v1415_v32 }
 0x1bf   :  { %810 = vmatpush1.bf16.msra.mxu0 %v1413_v33 }
 0x1c0   :  { %811 = vmatprep.subr.bf16.mxu0 %v1418_v34 }
 0x1c3   :  { %812 = vmatpush1.bf16.msra.mxu0 %v1416_v35 }
 0x1c4   :  { %813 = vmatprep.subr.bf16.mxu0 %v1421_v36  ;;  %v12_v36 = vstv %s1840_s6 }
 0x1c5   :  { %13 = vst [vmem:[#allocation2] sm:$0x1] %v12_v36 }
 0x1c7   :  { %814 = vmatpush1.bf16.msra.mxu0 %v1419_v37 }
 0x1c8   :  { %815 = vmatprep.subr.bf16.mxu0 %v1424_v38 }
 0x1cb   :  { %816 = vmatpush1.bf16.msra.mxu0 %v1422_v39 }
 0x1cc   :  { %817 = vmatprep.subr.bf16.mxu0 %v1427_v55 }
 0x1cf   :  { %818 = vmatpush1.bf16.msra.mxu0 %v1425_v56 }
 0x1d0   :  { %819 = vmatprep.subr.bf16.mxu0 %v1430_v57 }
 0x1d3   :  { %820 = vmatpush1.bf16.msra.mxu0 %v1428_v58 }
 0x1d4   :  { %821 = vmatprep.subr.bf16.mxu0 %v1433_v59 }
 0x1d7   :  { %822 = vmatpush1.bf16.msra.mxu0 %v1431_v60 }
 0x279   :  { %v506_v43 = vpop.f32.mrf.mxu0 }
 0x27a   :  { %v507_v44 = vadd.f32 %v506_v43, %v385_v41  ;;  %v1260_v43 = vld [vmem:[%s1841_s5] ss:$0 sm:$0xff] }
 0x27b   :  { %v508_v45 = vpop.f32.mrf.mxu0 }
 0x27c   :  { %v509_v47 = vadd.f32 %v508_v45, %v389_v42  ;;  %v513_v49 = vmax.f32 %v507_v44, 0.0 }
 0x27d   :  { %v510_v50 = vpop.f32.mrf.mxu0 }
 0x27e   :  { %v514_v51 = vmax.f32 %v509_v47, 0.0  ;;  %v515_v54 = vpack.c.bf16 %v513_v49, %v513_v49  ;;  %v1261_v47 = vld [vmem:[#allocation2] ss:$0 sm:$0xff] }
 0x27f   :  { %v511_v52 = vpop.f32.mrf.mxu0 }
 0x280   :  { %v516_v53 = vpack.c.bf16 %v514_v51, %v514_v51 }
 0x282   :  { %686 = vmatprep.mubr.bf16.mxu1 %v516_v53 }
 0x283   :  { %687 = vmatmul.mubr.bf16.vlgmr.msra.gmra.mxu1 %v515_v54 }
 0x284   :  { %1308 = vmatpush3.bf16.msra.mxu1 %v1435_v62 }
 0x285   :  { %1309 = vmatprep.subr.bf16.mxu1 %v1436_v63 }
 0x288   :  { %1310 = vmatpush3.bf16.msra.mxu1 %v1437_v0 }
 0x289   :  { %1311 = vmatprep.subr.bf16.mxu1 %v1438_v2 }
 0x28c   :  { %1312 = vmatpush3.bf16.msra.mxu1 %v1439_v3 }
 0x28d   :  { %1313 = vmatprep.subr.bf16.mxu1 %v1440_v4 }
 0x290   :  { %1314 = vmatpush3.bf16.msra.mxu1 %v1441_v5 }
 0x291   :  { %1315 = vmatprep.subr.bf16.mxu1 %v1442_v6 }
 0x294   :  { %1316 = vmatpush3.bf16.msra.mxu1 %v1443_v7 }
 0x295   :  { %1317 = vmatprep.subr.bf16.mxu1 %v1444_v8 }
 0x298   :  { %1318 = vmatpush3.bf16.msra.mxu1 %v1445_v9 }
 0x299   :  { %1319 = vmatprep.subr.bf16.mxu1 %v1446_v20 }
 0x29c   :  { %1320 = vmatpush3.bf16.msra.mxu1 %v1447_v21 }
 0x29d   :  { %1321 = vmatprep.subr.bf16.mxu1 %v1448_v22 }
 0x2a0   :  { %1322 = vmatpush3.bf16.msra.mxu1 %v1449_v23 }
 0x343   :  { %v1301_v10 = vpop.f32.mrf.mxu1 }
 0x345   :  { %v1302_v12 = vpop.f32.mrf.mxu1 }
 0x346   :  { %v1303_v13 = vadd.f32 %v1302_v12, %v1301_v10 }
 0x347   :  { %v1304_v14 = vpop.f32.mrf.mxu1 }
 0x348   :  { %v689_v15 = vadd.f32 %v1303_v13, %v1160_v11 }
 0x349   :  { %v1305_v16 = vpop.f32.mrf.mxu1 }
 0x34a   :  { %v694_v17 = vadd.f32 %v689_v15, %v1696_v25  ;;  %v720_v25 = vrot.slane %v1193_v24, %v1629_v46 }
 0x34c   :  { %v695_v18 = vmax.f32 %v694_v17, 0.0 }
 0x34e   :  { %v696_v19 = vpack.c.bf16 %v695_v18, %v695_v18 }
 0x350   :  { %840 = vmatmul.mubr.bf16.vlgmr.msra.gmra.mxu0 %v696_v19 }
 0x410   :  { %v841_v27 = vpop.f32.mrf.mxu0 }
 0x411   :  { %v842_v28 = vadd.f32 %v841_v27, %v720_v25 }
 0x412   :  { %v843_v29 = vpop.f32.mrf.mxu0 }
 0x413   :  { %v844_v30 = vadd.f32 %v843_v29, %v724_v26  ;;  %v848_v1 = vmax.f32 %v842_v28, 0.0 }
 0x414   :  { %v845_v31 = vpop.f32.mrf.mxu0 }
 0x415   :  { %v849_v32 = vmax.f32 %v844_v30, 0.0  ;;  %v850_v35 = vpack.c.bf16 %v848_v1, %v848_v1 }
 0x416   :  { %v846_v33 = vpop.f32.mrf.mxu0 }
 0x417   :  { %v851_v34 = vpack.c.bf16 %v849_v32, %v849_v32 }
 0x419   :  { %1021 = vmatprep.mubr.bf16.mxu1 %v851_v34 }
 0x41a   :  { %1022 = vmatmul.mubr.bf16.vlgmr.msra.gmra.mxu1 %v850_v35 }
 0x4da   :  { %v1323_v46 = vpop.f32.mrf.mxu1 }
 0x4dc   :  { %v1324_v37 = vpop.f32.mrf.mxu1 }
 0x4dd   :  { %v1325_v38 = vadd.f32 %v1324_v37, %v1323_v46 }
 0x4de   :  { %v1326_v39 = vpop.f32.mrf.mxu1 }
 0x4df   :  { %v1024_v40 = vadd.f32 %v1325_v38, %v1243_v48 }
 0x4e0   :  { %v1327_v41 = vpop.f32.mrf.mxu1 }
 0x4e1   :  { %v1029_v42 = vadd.f32 %v1024_v40, %v695_v18 }
 0x4e3   :  { %v1030_v44 = vmax.f32 %v1029_v42, 0.0 }
 0x4e5   :  { %v1038_v45 = vmul.f32 %v1260_v43, %v1030_v44 }
 0x4e7   :  { %1039 = vadd.xlane.f32.xlu0 %v1038_v45 }
 0x570   :  { %v1040_v49 = vpop.xlane.xlu0 %1039 }
 0x571   :  { %v1048_v50 = vadd.f32 %v1261_v47, %v1040_v49 }
 0x573   :  { %v1262_v51 = vmul.f32 -1.442695, %v1048_v50 }
 0x575   :  { %1450 = vpow2.f32 %v1262_v51 }
 0x582   :  { %v1451_v52 = vpop.eup %1450 }
 0x583   :  { %v1052_v53 = vadd.f32 1.0, %v1451_v52 }
 0x585   :  { %1452 = vrcp.f32 %v1052_v53 }
 0x592   :  { %v1453_v54 = vpop.eup %1452 }
 0x593   :  { %1056 = vst.msk [vmem:[%s1842_s7] sm:$0xff] %vm1055_vm0, %v1453_v54 }

</bundles_post_ra>
